<compile_context>
chip_gen: v6e
topology: v6e:2x2x1
jax: 0.10.0
libtpu: 0.0.40
codegen_flags: <defaults>
</compile_context>

<pallas_src>
from functools import partial

import jax
import jax.numpy as jnp
from jax import lax
from jax.experimental import pallas as pl
from jax.experimental.pallas import tpu as pltpu


# ------------------------------ fused kernel --------------------------------

def _bottleneck_kernel(xi_ref, xt_ref, xb_ref, w1_ref, b1_ref, w2_ref, b2_ref,
                       w3_ref, b3_ref, o_ref):
    """One (image n, row-tile r) step of the fused bottleneck.

    xi_ref: (1, th, W, Cin)   interior rows of this tile (also the residual)
    xt_ref: (1, 1, W, Cin)    clamped top-halo row (row0-1, or row0 at r==0)
    xb_ref: (1, 1, W, Cin)    clamped bottom-halo row
    w1_ref: (Cin, Cm)         conv1 weight, bn1 scale folded in
    w2_ref: (3, 3*Cm, Cm)     conv2 weight grouped by dx: [dx](dy*Cm, Cm), bn2 folded
    w3_ref: (Cm, Cout)        conv3 weight, bn3 scale folded in
    b*_ref: (1, C)            folded bn biases (f32)
    o_ref : (1, th, W, Cout)  output row tile
    """
    r = pl.program_id(1)
    n_r = pl.num_programs(1)
    th, W, Cin = xi_ref.shape[1], xi_ref.shape[2], xi_ref.shape[3]
    Cm = w1_ref.shape[1]
    Cout = w3_ref.shape[1]
    cdt = w1_ref.dtype                       # matmul input dtype (f32 or bf16)

    # --- stage 1: 1x1 conv + bn1 + relu, ONE matmul over th+2 rows ----------
    x_all = jnp.concatenate([xt_ref[0], xi_ref[0], xb_ref[0]], axis=0)   # (th+2, W, Cin)
    y1 = jnp.dot(x_all.reshape((th + 2) * W, Cin).astype(cdt), w1_ref[...],
                 preferred_element_type=jnp.float32)
    y1 = jnp.maximum(y1 + b1_ref[...], 0.0).reshape(th + 2, W, Cm)

    # zero halo rows that fall outside the image (conv2 zero-padding along H)
    rid = lax.broadcasted_iota(jnp.int32, (th + 2, 1, 1), 0)
    keep = jnp.logical_and(jnp.logical_or(rid > 0, r > 0),
                           jnp.logical_or(rid < th + 1, r < n_r - 1))
    y1 = jnp.where(keep, y1, 0.0)

    # single early cast to the compute dtype, then zero-pad W by one column
    y1c = y1.astype(cdt)
    zcol = jnp.zeros((th + 2, 1, Cm), cdt)
    y1p = jnp.concatenate([zcol, y1c, zcol], axis=1)       # (th+2, W+2, Cm)

    # --- stage 2: 3x3 conv as 3 accumulating matmuls grouped by dx ----------
    y2 = jnp.zeros((th * W, Cm), jnp.float32)
    for dx in range(3):                                     # static unroll
        shifted = y1p[:, dx:dx + W, :]                      # one sublane shift per dx
        patch = jnp.concatenate([shifted[dy:dy + th] for dy in range(3)],
                                axis=-1)                    # (th, W, 3*Cm)
        y2 = y2 + jnp.dot(patch.reshape(th * W, 3 * Cm), w2_ref[dx],
                          preferred_element_type=jnp.float32)
    y2 = jnp.maximum(y2 + b2_ref[...], 0.0)

    # --- stage 3: 1x1 conv + bn3 + residual (f32) + relu --------------------
    y3 = jnp.dot(y2.astype(cdt), w3_ref[...], preferred_element_type=jnp.float32)
    res = xi_ref[0].reshape(th * W, Cin).astype(jnp.float32)
    out = jnp.maximum(y3 + b3_ref[...] + res, 0.0)
    o_ref[...] = out.reshape(1, th, W, Cout).astype(o_ref.dtype)


# ------------------------------ wrappers -------------------------------------

def _fold_bn(gamma, beta, mean, var, eps=1e-5):
    scale = gamma / jnp.sqrt(var + eps)
    bias = beta - mean * scale
    return (scale.reshape(1, -1).astype(jnp.float32),
            bias.reshape(1, -1).astype(jnp.float32))


def bottleneck_forward_nhwc(x_nhwc, params, *, row_tile=16,
                            compute_dtype=jnp.float32):
    """Fused _Bottleneck forward on an NHWC tensor (stride=1, no downsample).

    row_tile: sweep per chip / per shape (v6e can take ~2x the v7x tile); the
    largest divisor of H <= row_tile is actually used.
    """
    N, H, W, Cin = x_nhwc.shape
    Cm = params["w1"].shape[1]
    Cout = params["w3"].shape[1]
    # stride=1 / downsample=None only: the residual add requires Cin == Cout.
    assert Cin == Cout, "residual add requires in_planes == planes * expansion"
    assert W % 8 == 0, "W must be a multiple of 8 (sublane tiling)"

    # Largest divisor of H <= row_tile (never fall back to a whole-image tile).
    th = max(d for d in range(1, min(row_tile, H) + 1) if H % d == 0)
    n_r = H // th

    s1, b1 = _fold_bn(**params["bn1"])
    s2, b2 = _fold_bn(**params["bn2"])
    s3, b3 = _fold_bn(**params["bn3"])

    cdt = compute_dtype
    # Fold BN scale into conv weights (per output channel).
    w1s = (params["w1"] * s1).astype(cdt)                               # (Cin, Cm)
    w2 = params["w2"]                                                   # (3,3,Cm,Cm) HWIO
    w2g = jnp.stack([w2[:, dx].reshape(3 * Cm, Cm) for dx in range(3)], axis=0)
    w2s = (w2g * s2).astype(cdt)                                        # (3, 3*Cm, Cm)
    w3s = (params["w3"] * s3).astype(cdt)                               # (Cm, Cout)
    # x stays in its own dtype: residual is added in f32 inside the kernel;
    # only the matmul inputs are cast to compute_dtype in-kernel.

    flops = 2 * N * H * W * (Cin * Cm + 9 * Cm * Cm + Cm * Cout)
    bpe_x = x_nhwc.dtype.itemsize
    bpe_c = jnp.dtype(cdt).itemsize
    bytes_accessed = (N * H * W * Cin * bpe_x + N * H * W * Cout * bpe_x
                      + (w1s.size + w2s.size + w3s.size) * bpe_c
                      + (b1.size + b2.size + b3.size) * 4)

    # Per-step VMEM footprint estimate -> explicit scoped limit (stay under
    # v7x's 64 MiB; default scoped limit would silently cap the tile size).
    step_bytes = (2 * (th + 2) * W * Cin * bpe_x          # x blocks (double-buffered)
                  + 2 * th * W * Cout * bpe_x             # out block
                  + (th + 2) * (W + 2) * Cm * (4 + bpe_c)  # y1 (f32) + y1p (cdt)
                  + th * W * 3 * Cm * bpe_c               # one dx patch group
                  + th * W * (Cm + Cout) * 4              # y2 acc + y3
                  + 2 * (w1s.size + w2s.size + w3s.size) * bpe_c)
    vmem_limit = int(min(64 * 2**20, max(32 * 2**20, 4 * step_bytes)))

    return pl.pallas_call(
        _bottleneck_kernel,
        out_shape=jax.ShapeDtypeStruct((N, H, W, Cout), x_nhwc.dtype),
        grid=(N, n_r),
        in_specs=[
            # interior rows of this tile (also used as the residual)
            pl.BlockSpec((1, th, W, Cin), lambda n, r: (n, r, 0, 0)),
            # clamped 1-row halos (block size 1 along H -> index is the row)
            pl.BlockSpec((1, 1, W, Cin),
                         lambda n, r: (n, jnp.maximum(r * th - 1, 0), 0, 0)),
            pl.BlockSpec((1, 1, W, Cin),
                         lambda n, r: (n, jnp.minimum((r + 1) * th, H - 1), 0, 0)),
            pl.BlockSpec((Cin, Cm), lambda n, r: (0, 0)),
            pl.BlockSpec((1, Cm), lambda n, r: (0, 0)),
            pl.BlockSpec((3, 3 * Cm, Cm), lambda n, r: (0, 0, 0)),
            pl.BlockSpec((1, Cm), lambda n, r: (0, 0)),
            pl.BlockSpec((Cm, Cout), lambda n, r: (0, 0)),
            pl.BlockSpec((1, Cout), lambda n, r: (0, 0)),
        ],
        out_specs=pl.BlockSpec((1, th, W, Cout), lambda n, r: (n, r, 0, 0)),
        compiler_params=pltpu.CompilerParams(
            # every (n, r) step is independent -> both axes parallel so v7x's
            # 2 TensorCores get work even for N=1 / odd N.
            dimension_semantics=("parallel", "parallel"),
            vmem_limit_bytes=vmem_limit),
        cost_estimate=pl.CostEstimate(flops=int(flops), transcendentals=0,
                                      bytes_accessed=int(bytes_accessed)),
    )(x_nhwc, x_nhwc, x_nhwc, w1s, b1, w2s, b2, w3s, b3)


def bottleneck_forward(x_nchw, params, *, row_tile=16,
                       compute_dtype=jnp.float32):
    """PyTorch-parity entry point (NCHW in / NCHW out).

    The NCHW<->NHWC transposes are layout plumbing outside the hot kernel; use
    bottleneck_forward_nhwc end-to-end to avoid them.
    """
    x_nhwc = jnp.transpose(x_nchw, (0, 2, 3, 1))
    out = bottleneck_forward_nhwc(x_nhwc, params, row_tile=row_tile,
                                  compute_dtype=compute_dtype)
    return jnp.transpose(out, (0, 3, 1, 2))


# ------------------------------ params ---------------------------------------

def init_bottleneck_params(key, in_planes, planes, expansion=4):
    k1, k2, k3 = jax.random.split(key, 3)
    out_planes = planes * expansion
    p = {}
    # conv weights stored channels-last for the kernel:
    # W1: (Cin, planes), W2: (3, 3, planes, planes) [HWIO], W3: (planes, 4*planes)
    p["w1"] = (jax.random.normal(k1, (in_planes, planes), jnp.float32)
               * (1.0 / jnp.sqrt(in_planes)))
    p["w2"] = (jax.random.normal(k2, (3, 3, planes, planes), jnp.float32)
               * (1.0 / jnp.sqrt(9.0 * planes)))
    p["w3"] = (jax.random.normal(k3, (planes, out_planes), jnp.float32)
               * (1.0 / jnp.sqrt(planes)))
    # BN params (deterministic, inference mode).
    for name, c in (("bn1", planes), ("bn2", planes), ("bn3", out_planes)):
        r = jnp.arange(c, dtype=jnp.float32)
        p[name] = dict(gamma=1.0 + 0.01 * r,
                       beta=0.02 * r - 0.05,
                       mean=0.01 * r,
                       var=1.0 + 0.05 * r)
    return p


# ------------------------------ reference ------------------------------------

def bottleneck_reference(x_nchw, params):
    """Pure-JAX NCHW reference matching torch Conv2d/BatchNorm2d(eval)/ReLU."""
    def conv(x, w_oihw, pad):
        return lax.conv_general_dilated(
            x, w_oihw, window_strides=(1, 1), padding=pad,
            dimension_numbers=("NCHW", "OIHW", "NCHW"))

    def bn(x, b):
        s = b["gamma"] / jnp.sqrt(b["var"] + 1e-5)
        o = b["beta"] - b["mean"] * s
        return x * s[None, :, None, None] + o[None, :, None, None]

    w1 = jnp.transpose(params["w1"], (1, 0))[:, :, None, None]   # OIHW
    w2 = jnp.transpose(params["w2"], (3, 2, 0, 1))                # OIHW
    w3 = jnp.transpose(params["w3"], (1, 0))[:, :, None, None]    # OIHW

    out = jax.nn.relu(bn(conv(x_nchw, w1, "VALID"), params["bn1"]))
    out = jax.nn.relu(bn(conv(out, w2, [(1, 1), (1, 1)]), params["bn2"]))
    out = bn(conv(out, w3, "VALID"), params["bn3"])
    return jax.nn.relu(out + x_nchw)


# ------------------------------ main ------------------------------------------

if __name__ == "__main__":
    key = jax.random.PRNGKey(0)
    kx, kp = jax.random.split(key)

    N, in_planes, H, W = 2, 16, 16, 16
    planes = 4                      # expansion=4 -> out channels = 16 = in_planes
    # NOTE: real deployments should use channel counts that are multiples of
    # 128 for lane-dense stores / full MXU columns; this is a tiny parity test.
    x = jax.random.normal(kx, (N, in_planes, H, W), jnp.float32)
    params = init_bottleneck_params(kp, in_planes, planes)

    ref = bottleneck_reference(x, params)

    # f32 path: exact parity with the PyTorch-style reference.
    # Sweep a few row tiles (exercises multi-tile halo path and single-tile).
    for rt in (4, 8, 16):
        out = jax.jit(partial(bottleneck_forward, params=params, row_tile=rt))(x)
        out = jax.block_until_ready(out)
        assert out.shape == (N, in_planes, H, W)
        err = jnp.max(jnp.abs(out - ref))
        assert jnp.allclose(out, ref, atol=5e-4, rtol=5e-4), \
            f"f32 (row_tile={rt}) max abs err = {err}"

    # bf16 matmul inputs (MXU fast path on v5e/v6e/v7x), f32 accumulate,
    # f32 epilogue and f32 residual/skip.
    out16 = jax.jit(partial(bottleneck_forward, params=params, row_tile=8,
                            compute_dtype=jnp.bfloat16))(x)
    out16 = jax.block_until_ready(out16).astype(jnp.float32)
    err16 = jnp.max(jnp.abs(out16 - ref))
    assert bool(jnp.all(jnp.isfinite(out16)))
    assert jnp.allclose(out16, ref, atol=0.3, rtol=0.05), f"bf16 max abs err = {err16}"

    print("KERNEL_OK")
</pallas_src>

<mosaic_0001>
module attributes {stable_mosaic.version = 11 : i64} {
  func.func @_bottleneck_kernel(%arg0: i32, %arg1: i32, %arg2: memref<1x4x16x16xf32, #tpu.memory_space<vmem>>, %arg3: memref<1x1x16x16xf32, #tpu.memory_space<vmem>>, %arg4: memref<1x1x16x16xf32, #tpu.memory_space<vmem>>, %arg5: memref<16x4xf32, #tpu.memory_space<vmem>>, %arg6: memref<1x4xf32, #tpu.memory_space<vmem>>, %arg7: memref<3x12x4xf32, #tpu.memory_space<vmem>>, %arg8: memref<1x4xf32, #tpu.memory_space<vmem>>, %arg9: memref<4x16xf32, #tpu.memory_space<vmem>>, %arg10: memref<1x16xf32, #tpu.memory_space<vmem>>, %arg11: memref<1x4x16x16xf32, #tpu.memory_space<vmem>>) attributes {dimension_semantics = [#tpu.dimension_semantics<parallel>, #tpu.dimension_semantics<parallel>], iteration_bounds = array<i64: 2, 4>, scalar_prefetch = 0 : i64, scratch_operands = 0 : i64, tpu.core_type = #tpu.core_type<tc>, window_params = [{transform_indices = @transform_0, window_bounds = array<i64: 1, 4, 16, 16>}, {transform_indices = @transform_1, window_bounds = array<i64: 1, 1, 16, 16>}, {transform_indices = @transform_2, window_bounds = array<i64: 1, 1, 16, 16>}, {pipeline_mode = #tpu.pipeline_mode<synchronous>, transform_indices = @transform_3, window_bounds = array<i64: 16, 4>}, {pipeline_mode = #tpu.pipeline_mode<synchronous>, transform_indices = @transform_4, window_bounds = array<i64: 1, 4>}, {pipeline_mode = #tpu.pipeline_mode<synchronous>, transform_indices = @transform_5, window_bounds = array<i64: 3, 12, 4>}, {pipeline_mode = #tpu.pipeline_mode<synchronous>, transform_indices = @transform_6, window_bounds = array<i64: 1, 4>}, {pipeline_mode = #tpu.pipeline_mode<synchronous>, transform_indices = @transform_7, window_bounds = array<i64: 4, 16>}, {pipeline_mode = #tpu.pipeline_mode<synchronous>, transform_indices = @transform_8, window_bounds = array<i64: 1, 16>}, {transform_indices = @transform_9, window_bounds = array<i64: 1, 4, 16, 16>}]} {
    %c0 = arith.constant 0 : index
    %c0_0 = arith.constant 0 : index
    %c0_1 = arith.constant 0 : index
    %c0_2 = arith.constant 0 : index
    %0 = vector.load %arg3[%c0, %c0_0, %c0_1, %c0_2] : memref<1x1x16x16xf32, #tpu.memory_space<vmem>>, vector<1x1x16x16xf32>
    %1 = vector.shape_cast %0 : vector<1x1x16x16xf32> to vector<1x16x16xf32>
    %c0_3 = arith.constant 0 : index
    %c0_4 = arith.constant 0 : index
    %c0_5 = arith.constant 0 : index
    %c0_6 = arith.constant 0 : index
    %2 = vector.load %arg2[%c0_3, %c0_4, %c0_5, %c0_6] : memref<1x4x16x16xf32, #tpu.memory_space<vmem>>, vector<1x4x16x16xf32>
    %3 = vector.shape_cast %2 : vector<1x4x16x16xf32> to vector<4x16x16xf32>
    %c0_7 = arith.constant 0 : index
    %c0_8 = arith.constant 0 : index
    %c0_9 = arith.constant 0 : index
    %c0_10 = arith.constant 0 : index
    %4 = vector.load %arg4[%c0_7, %c0_8, %c0_9, %c0_10] : memref<1x1x16x16xf32, #tpu.memory_space<vmem>>, vector<1x1x16x16xf32>
    %5 = vector.shape_cast %4 : vector<1x1x16x16xf32> to vector<1x16x16xf32>
    %6 = tpu.concatenate %1, %3, %5 in 0 : vector<1x16x16xf32>, vector<4x16x16xf32>, vector<1x16x16xf32> -> vector<6x16x16xf32>
    %7 = vector.shape_cast %6 : vector<6x16x16xf32> to vector<96x16xf32>
    %c0_11 = arith.constant 0 : index
    %c0_12 = arith.constant 0 : index
    %8 = vector.load %arg5[%c0_11, %c0_12] : memref<16x4xf32, #tpu.memory_space<vmem>>, vector<16x4xf32>
    %cst = arith.constant dense<0.000000e+00> : vector<96x4xf32>
    %9 = tpu.matmul %7, %8, %cst {dimension_numbers = #tpu.dot_dimension_numbers<[1], [0], [0], [1], [0, 0, 1, 1], [], []>} : vector<96x16xf32>, vector<16x4xf32>, vector<96x4xf32> -> vector<96x4xf32>
    %c0_13 = arith.constant 0 : index
    %c0_14 = arith.constant 0 : index
    %10 = vector.load %arg6[%c0_13, %c0_14] : memref<1x4xf32, #tpu.memory_space<vmem>>, vector<1x4xf32>
    %11 = vector.broadcast %10 : vector<1x4xf32> to vector<96x4xf32>
    %12 = arith.addf %9, %11 : vector<96x4xf32>
    %cst_15 = arith.constant 0.000000e+00 : f32
    %13 = vector.broadcast %cst_15 : f32 to vector<96x4xf32>
    %14 = arith.maximumf %12, %13 : vector<96x4xf32>
    %15 = vector.shape_cast %14 : vector<96x4xf32> to vector<6x16x4xf32>
    %16 = tpu.iota {dimensions = array<i32: 0>} : vector<6x1x1xi32>
    %c0_i32 = arith.constant 0 : i32
    %17 = vector.broadcast %c0_i32 : i32 to vector<6x1x1xi32>
    %18 = arith.cmpi sgt, %16, %17 : vector<6x1x1xi32>
    %c0_i32_16 = arith.constant 0 : i32
    %19 = arith.cmpi sgt, %arg1, %c0_i32_16 : i32
    %20 = vector.broadcast %19 : i1 to vector<6x1x1xi1>
    %21 = arith.ori %18, %20 : vector<6x1x1xi1>
    %c5_i32 = arith.constant 5 : i32
    %22 = vector.broadcast %c5_i32 : i32 to vector<6x1x1xi32>
    %23 = arith.cmpi slt, %16, %22 : vector<6x1x1xi32>
    %c3_i32 = arith.constant 3 : i32
    %24 = arith.cmpi slt, %arg1, %c3_i32 : i32
    %25 = vector.broadcast %24 : i1 to vector<6x1x1xi1>
    %26 = arith.ori %23, %25 : vector<6x1x1xi1>
    %27 = arith.andi %21, %26 : vector<6x1x1xi1>
    %cst_17 = arith.constant 0.000000e+00 : f32
    %28 = vector.shape_cast %27 : vector<6x1x1xi1> to vector<6x1x1xi1>
    %29 = vector.broadcast %28 : vector<6x1x1xi1> to vector<6x16x4xi1>
    %30 = vector.broadcast %cst_17 : f32 to vector<6x16x4xf32>
    %31 = arith.select %29, %15, %30 : vector<6x16x4xi1>, vector<6x16x4xf32>
    %cst_18 = arith.constant 0.000000e+00 : f32
    %32 = vector.broadcast %cst_18 : f32 to vector<6x1x4xf32>
    %33 = tpu.concatenate %32, %31, %32 in 1 : vector<6x1x4xf32>, vector<6x16x4xf32>, vector<6x1x4xf32> -> vector<6x18x4xf32>
    %cst_19 = arith.constant 0.000000e+00 : f32
    %34 = vector.broadcast %cst_19 : f32 to vector<64x4xf32>
    %35 = vector.extract_strided_slice %33 {offsets = [0, 0, 0], sizes = [6, 16, 4], strides = [1, 1, 1]} : vector<6x18x4xf32> to vector<6x16x4xf32>
    %36 = vector.extract_strided_slice %35 {offsets = [0, 0, 0], sizes = [4, 16, 4], strides = [1, 1, 1]} : vector<6x16x4xf32> to vector<4x16x4xf32>
    %37 = vector.extract_strided_slice %35 {offsets = [1, 0, 0], sizes = [4, 16, 4], strides = [1, 1, 1]} : vector<6x16x4xf32> to vector<4x16x4xf32>
    %38 = vector.extract_strided_slice %35 {offsets = [2, 0, 0], sizes = [4, 16, 4], strides = [1, 1, 1]} : vector<6x16x4xf32> to vector<4x16x4xf32>
    %39 = tpu.concatenate %36, %37, %38 in 2 : vector<4x16x4xf32>, vector<4x16x4xf32>, vector<4x16x4xf32> -> vector<4x16x12xf32>
    %40 = vector.shape_cast %39 : vector<4x16x12xf32> to vector<64x12xf32>
    %c0_20 = arith.constant 0 : index
    %c0_21 = arith.constant 0 : index
    %c0_22 = arith.constant 0 : index
    %41 = vector.load %arg7[%c0_20, %c0_21, %c0_22] : memref<3x12x4xf32, #tpu.memory_space<vmem>>, vector<1x12x4xf32>
    %42 = vector.shape_cast %41 : vector<1x12x4xf32> to vector<12x4xf32>
    %cst_23 = arith.constant dense<0.000000e+00> : vector<64x4xf32>
    %43 = tpu.matmul %40, %42, %cst_23 {dimension_numbers = #tpu.dot_dimension_numbers<[1], [0], [0], [1], [0, 0, 1, 1], [], []>} : vector<64x12xf32>, vector<12x4xf32>, vector<64x4xf32> -> vector<64x4xf32>
    %44 = arith.addf %34, %43 : vector<64x4xf32>
    %45 = vector.extract_strided_slice %33 {offsets = [0, 1, 0], sizes = [6, 16, 4], strides = [1, 1, 1]} : vector<6x18x4xf32> to vector<6x16x4xf32>
    %46 = vector.extract_strided_slice %45 {offsets = [0, 0, 0], sizes = [4, 16, 4], strides = [1, 1, 1]} : vector<6x16x4xf32> to vector<4x16x4xf32>
    %47 = vector.extract_strided_slice %45 {offsets = [1, 0, 0], sizes = [4, 16, 4], strides = [1, 1, 1]} : vector<6x16x4xf32> to vector<4x16x4xf32>
    %48 = vector.extract_strided_slice %45 {offsets = [2, 0, 0], sizes = [4, 16, 4], strides = [1, 1, 1]} : vector<6x16x4xf32> to vector<4x16x4xf32>
    %49 = tpu.concatenate %46, %47, %48 in 2 : vector<4x16x4xf32>, vector<4x16x4xf32>, vector<4x16x4xf32> -> vector<4x16x12xf32>
    %50 = vector.shape_cast %49 : vector<4x16x12xf32> to vector<64x12xf32>
    %c1 = arith.constant 1 : index
    %c0_24 = arith.constant 0 : index
    %c0_25 = arith.constant 0 : index
    %51 = vector.load %arg7[%c1, %c0_24, %c0_25] : memref<3x12x4xf32, #tpu.memory_space<vmem>>, vector<1x12x4xf32>
    %52 = vector.shape_cast %51 : vector<1x12x4xf32> to vector<12x4xf32>
    %cst_26 = arith.constant dense<0.000000e+00> : vector<64x4xf32>
    %53 = tpu.matmul %50, %52, %cst_26 {dimension_numbers = #tpu.dot_dimension_numbers<[1], [0], [0], [1], [0, 0, 1, 1], [], []>} : vector<64x12xf32>, vector<12x4xf32>, vector<64x4xf32> -> vector<64x4xf32>
    %54 = arith.addf %44, %53 : vector<64x4xf32>
    %55 = vector.extract_strided_slice %33 {offsets = [0, 2, 0], sizes = [6, 16, 4], strides = [1, 1, 1]} : vector<6x18x4xf32> to vector<6x16x4xf32>
    %56 = vector.extract_strided_slice %55 {offsets = [0, 0, 0], sizes = [4, 16, 4], strides = [1, 1, 1]} : vector<6x16x4xf32> to vector<4x16x4xf32>
    %57 = vector.extract_strided_slice %55 {offsets = [1, 0, 0], sizes = [4, 16, 4], strides = [1, 1, 1]} : vector<6x16x4xf32> to vector<4x16x4xf32>
    %58 = vector.extract_strided_slice %55 {offsets = [2, 0, 0], sizes = [4, 16, 4], strides = [1, 1, 1]} : vector<6x16x4xf32> to vector<4x16x4xf32>
    %59 = tpu.concatenate %56, %57, %58 in 2 : vector<4x16x4xf32>, vector<4x16x4xf32>, vector<4x16x4xf32> -> vector<4x16x12xf32>
    %60 = vector.shape_cast %59 : vector<4x16x12xf32> to vector<64x12xf32>
    %c2 = arith.constant 2 : index
    %c0_27 = arith.constant 0 : index
    %c0_28 = arith.constant 0 : index
    %61 = vector.load %arg7[%c2, %c0_27, %c0_28] : memref<3x12x4xf32, #tpu.memory_space<vmem>>, vector<1x12x4xf32>
    %62 = vector.shape_cast %61 : vector<1x12x4xf32> to vector<12x4xf32>
    %cst_29 = arith.constant dense<0.000000e+00> : vector<64x4xf32>
    %63 = tpu.matmul %60, %62, %cst_29 {dimension_numbers = #tpu.dot_dimension_numbers<[1], [0], [0], [1], [0, 0, 1, 1], [], []>} : vector<64x12xf32>, vector<12x4xf32>, vector<64x4xf32> -> vector<64x4xf32>
    %64 = arith.addf %54, %63 : vector<64x4xf32>
    %c0_30 = arith.constant 0 : index
    %c0_31 = arith.constant 0 : index
    %65 = vector.load %arg8[%c0_30, %c0_31] : memref<1x4xf32, #tpu.memory_space<vmem>>, vector<1x4xf32>
    %66 = vector.broadcast %65 : vector<1x4xf32> to vector<64x4xf32>
    %67 = arith.addf %64, %66 : vector<64x4xf32>
    %cst_32 = arith.constant 0.000000e+00 : f32
    %68 = vector.broadcast %cst_32 : f32 to vector<64x4xf32>
    %69 = arith.maximumf %67, %68 : vector<64x4xf32>
    %c0_33 = arith.constant 0 : index
    %c0_34 = arith.constant 0 : index
    %70 = vector.load %arg9[%c0_33, %c0_34] : memref<4x16xf32, #tpu.memory_space<vmem>>, vector<4x16xf32>
    %cst_35 = arith.constant dense<0.000000e+00> : vector<64x16xf32>
    %71 = tpu.matmul %69, %70, %cst_35 {dimension_numbers = #tpu.dot_dimension_numbers<[1], [0], [0], [1], [0, 0, 1, 1], [], []>} : vector<64x4xf32>, vector<4x16xf32>, vector<64x16xf32> -> vector<64x16xf32>
    %c0_36 = arith.constant 0 : index
    %c0_37 = arith.constant 0 : index
    %c0_38 = arith.constant 0 : index
    %c0_39 = arith.constant 0 : index
    %72 = vector.load %arg2[%c0_36, %c0_37, %c0_38, %c0_39] : memref<1x4x16x16xf32, #tpu.memory_space<vmem>>, vector<1x4x16x16xf32>
    %73 = vector.shape_cast %72 : vector<1x4x16x16xf32> to vector<4x16x16xf32>
    %74 = vector.shape_cast %73 : vector<4x16x16xf32> to vector<64x16xf32>
    %c0_40 = arith.constant 0 : index
    %c0_41 = arith.constant 0 : index
    %75 = vector.load %arg10[%c0_40, %c0_41] : memref<1x16xf32, #tpu.memory_space<vmem>>, vector<1x16xf32>
    %76 = vector.broadcast %75 : vector<1x16xf32> to vector<64x16xf32>
    %77 = arith.addf %71, %76 : vector<64x16xf32>
    %78 = arith.addf %77, %74 : vector<64x16xf32>
    %cst_42 = arith.constant 0.000000e+00 : f32
    %79 = vector.broadcast %cst_42 : f32 to vector<64x16xf32>
    %80 = arith.maximumf %78, %79 : vector<64x16xf32>
    %81 = vector.shape_cast %80 : vector<64x16xf32> to vector<1x4x16x16xf32>
    %c0_43 = arith.constant 0 : index
    %c0_44 = arith.constant 0 : index
    %c0_45 = arith.constant 0 : index
    %c0_46 = arith.constant 0 : index
    %82 = vector.load %arg11[%c0_43, %c0_44, %c0_45, %c0_46] : memref<1x4x16x16xf32, #tpu.memory_space<vmem>>, vector<1x4x16x16xf32>
    tpu.vector_store %arg11[%c0_43, %c0_44, %c0_45, %c0_46], %81 {strides = array<i32>} : memref<1x4x16x16xf32, #tpu.memory_space<vmem>>, vector<1x4x16x16xf32>,
    return
  }
  func.func @transform_0(%arg0: i32, %arg1: i32) -> (i32, i32, i32, i32) {
    %c0_i32 = arith.constant 0 : i32
    %c0_i32_0 = arith.constant 0 : i32
    %c0_i32_1 = arith.constant 0 : i32
    return %arg0, %arg1, %c0_i32, %c0_i32_0 : i32, i32, i32, i32
  }
  func.func @transform_1(%arg0: i32, %arg1: i32) -> (i32, i32, i32, i32) {
    %c4_i32 = arith.constant 4 : i32
    %0 = arith.muli %arg1, %c4_i32 : i32
    %c1_i32 = arith.constant 1 : i32
    %1 = arith.subi %0, %c1_i32 : i32
    %c0_i32 = arith.constant 0 : i32
    %2 = arith.maxsi %1, %c0_i32 : i32
    %c0_i32_0 = arith.constant 0 : i32
    %c0_i32_1 = arith.constant 0 : i32
    %c0_i32_2 = arith.constant 0 : i32
    return %arg0, %2, %c0_i32_0, %c0_i32_1 : i32, i32, i32, i32
  }
  func.func @transform_2(%arg0: i32, %arg1: i32) -> (i32, i32, i32, i32) {
    %c1_i32 = arith.constant 1 : i32
    %0 = arith.addi %arg1, %c1_i32 : i32
    %c4_i32 = arith.constant 4 : i32
    %1 = arith.muli %0, %c4_i32 : i32
    %c15_i32 = arith.constant 15 : i32
    %2 = arith.minsi %1, %c15_i32 : i32
    %c0_i32 = arith.constant 0 : i32
    %c0_i32_0 = arith.constant 0 : i32
    %c0_i32_1 = arith.constant 0 : i32
    return %arg0, %2, %c0_i32, %c0_i32_0 : i32, i32, i32, i32
  }
  func.func @transform_3(%arg0: i32, %arg1: i32) -> (i32, i32) {
    %c0_i32 = arith.constant 0 : i32
    %c0_i32_0 = arith.constant 0 : i32
    %c0_i32_1 = arith.constant 0 : i32
    return %c0_i32, %c0_i32_0 : i32, i32
  }
  func.func @transform_4(%arg0: i32, %arg1: i32) -> (i32, i32) {
    %c0_i32 = arith.constant 0 : i32
    %c0_i32_0 = arith.constant 0 : i32
    %c0_i32_1 = arith.constant 0 : i32
    return %c0_i32, %c0_i32_0 : i32, i32
  }
  func.func @transform_5(%arg0: i32, %arg1: i32) -> (i32, i32, i32) {
    %c0_i32 = arith.constant 0 : i32
    %c0_i32_0 = arith.constant 0 : i32
    %c0_i32_1 = arith.constant 0 : i32
    %c0_i32_2 = arith.constant 0 : i32
    return %c0_i32, %c0_i32_0, %c0_i32_1 : i32, i32, i32
  }
  func.func @transform_6(%arg0: i32, %arg1: i32) -> (i32, i32) {
    %c0_i32 = arith.constant 0 : i32
    %c0_i32_0 = arith.constant 0 : i32
    %c0_i32_1 = arith.constant 0 : i32
    return %c0_i32, %c0_i32_0 : i32, i32
  }
  func.func @transform_7(%arg0: i32, %arg1: i32) -> (i32, i32) {
    %c0_i32 = arith.constant 0 : i32
    %c0_i32_0 = arith.constant 0 : i32
    %c0_i32_1 = arith.constant 0 : i32
    return %c0_i32, %c0_i32_0 : i32, i32
  }
  func.func @transform_8(%arg0: i32, %arg1: i32) -> (i32, i32) {
    %c0_i32 = arith.constant 0 : i32
    %c0_i32_0 = arith.constant 0 : i32
    %c0_i32_1 = arith.constant 0 : i32
    return %c0_i32, %c0_i32_0 : i32, i32
  }
  func.func @transform_9(%arg0: i32, %arg1: i32) -> (i32, i32, i32, i32) {
    %c0_i32 = arith.constant 0 : i32
    %c0_i32_0 = arith.constant 0 : i32
    %c0_i32_1 = arith.constant 0 : i32
    return %arg0, %arg1, %c0_i32, %c0_i32_0 : i32, i32, i32, i32
  }
}

</mosaic_0001>

<bundles_post_ra>
// kernel: bottleneck_forward.1
= control target key start
LH: loop header
LB: loop body
LE: loop exit
PB: predicated region body
PF: predicated region fallthrough
CT: control target
= control target key end

     0   :  { %s2035_s30 = smov 0   ;;  %s2037_s10 = smov 0   ;;  %s2440_s0 = inlined_call_operand.vmem [shape: f32[2,16,16,16], index: 0, kind: input, shape index: {}, may-alias: {0,1,2}]   ;;  %s2441_s1 = inlined_call_operand.vmem [shape: f32[2,16,16,16], index: 1, kind: input, shape index: {}, may-alias: {0,1,2}]   ;;  %s2442_s2 = inlined_call_operand.vmem [shape: f32[2,16,16,16], index: 2, kind: input, shape index: {}, may-alias: {0,1,2}]   ;;  %s2443_s3 = inlined_call_operand.vmem [shape: f32[16,4], index: 3, kind: input, shape index: {}]   ;;  %s2444_s4 = inlined_call_operand.vmem [shape: f32[1,4], index: 4, kind: input, shape index: {}, may-alias: {4,6}]   ;;  %s2445_s5 = inlined_call_operand.vmem [shape: f32[3,12,4], index: 5, kind: input, shape index: {}]   ;;  %s2446_s6 = inlined_call_operand.vmem [shape: f32[1,4], index: 6, kind: input, shape index: {}, may-alias: {4,6}]   ;;  %s2447_s7 = inlined_call_operand.vmem [shape: f32[4,16], index: 7, kind: input, shape index: {}]   ;;  %s2448_s8 = inlined_call_operand.vmem [shape: f32[1,16], index: 8, kind: input, shape index: {}]   ;;  %s2449_s9 = inlined_call_operand.vmem [shape: f32[2,16,16,16], index: 9, kind: output, shape index: {}]  }
   0x1   :  { %s2039_s11 = smov 0   ;;  %s2041_s12 = smov 0  }
   0x2   :  { %s2043_s13 = smov 0  }
   0x3 LB: > { %s28_s14 = sadd.s32 1, %s1973_s11  ;;  %s31_s15 = sadd.s32 1, %s1977_s12  ;;  %s1981_s13 = sphi %s2043_s13, %s19_s13   ;;  %s1977_s12 = sphi %s2041_s12, %s2454_s12   ;;  %s1973_s11 = sphi %s2039_s11, %s2453_s11   ;;  %s1969_s10 = sphi %s2037_s10, %s2452_s10   ;;  %s1965_s30 = sphi %s2035_s30, %s2451_s30  }
   0x4   : > { %p29_p0 = scmp.ge.s32.totalorder %s28_s14, 4  ;;  %p1669_p1 = scmp.ge.s32.totalorder %s1981_s13, 1 }
   0x5   : > { %p373_p2 = scmp.lt.s32.totalorder %s1981_s13, 9 }
   0x6   : > { %s2456_s14 = smov (%p29_p0, %s28_s14), 0  ;;  %s2458_s15 = smov (!%p29_p0, %s31_s15), %s1977_s12 }
   0x7   : > { %p374_p3 = pnand %p1669_p1, %p373_p2  ;;  %p33_p4 = scmp.ge.s32.totalorder %s2458_s15, 2 }
   0x8   : > { %s1670_s20 = sshll.u32 (!%p374_p3), %s1965_s30, 2  ;;  %p446_p5 = scmp.lt.s32.totalorder (!%p374_p3), %s1969_s10, 1 }
   0x9   : > { %s2460_s15 = smov (%p33_p4, %s2458_s15), 0  ;;  %377 = sbr.rel (%p374_p3) target bundleno = 815 (0x32f), region = 56 }
   0xa   : > { %p448_p6 = scmp.lt.s32.totalorder (!%p374_p3), %s1670_s20, 15  ;;  %s1675_s21 = sadd.s32 (!%p374_p3), 4294967295, %s1670_s20 }
   0xb   : > { %p458_p7 = scmp.gt.s32.totalorder (!%p374_p3), %s1675_s21, 0  ;;  %s1759_s25 = sadd.s32 (!%p374_p3), 4, %s1670_s20 }
   0xc   : > { %p1676_p8 = scmp.lt.s32.totalorder (!%p374_p3), %s1675_s21, 15  ;;  %p2079_p9 = scmp.lt.s32.totalorder (!%p374_p3), %s1759_s25, 15 }
   0xd   : > { %p696_p10 = scmp.gt.s32.totalorder (!%p374_p3), %s1965_s30, 0  ;;  %p700_p11 = scmp.lt.s32.totalorder (!%p374_p3), %s1965_s30, 3 }
   0xe   : > { %v514_v0 = vld [vmem:[%s2443_s3 + $0x8] sm:$0xff]  ;;  %v513_v1 = vld [vmem:[%s2443_s3] sm:$0xff]  ;;  %s2462_s10 = smov (!%p446_p5, %s1969_s10), 1  ;;  %s2464_s21 = smov (!%p458_p7, %s1675_s21), 0  ;;  %vm522_vm0 = vcmask 130048   ;;  %vm732_vm2 = vcmask 1040384  }
   0xf   : > { %1813 = vmatprep.subr.mxu0 %v514_v0  ;;  %s449_s22 = scalar_select %p448_p6, %s1670_s20, 15  ;;  %v2141_v14 = vld [vmem:[%s2444_s4] ss:$0 sm:$0xff]  ;;  %v1709_v56 = vld [vmem:[%s2445_s5 + $0x18] sm:$0xf]  ;;  %vm942_vm3 = vcmask 1043456  }
  0x10   : > { %1814 = vmatpush3.msra.mxu0 %v514_v0  ;;  %s2074_s24 = sshll.u32 %s2462_s10, 5  ;;  %s2466_s21 = smov (!%p1676_p8, %s2464_s21), 15  ;;  %1897 = vmatprep.subr.msk.mxu1 %vm942_vm3, %v1709_v56  ;;  %v1708_v58 = vld [vmem:[%s2445_s5 + $0x10] sm:$0xff]  ;;  %vm832_vm5 = vcmask 31744   ;;  %vm841_vm6 = vcmask 64512   ;;  %vm901_vm7 = vcmask 1046528  }
  0x11   : > { %1815 = vmatprep.subr.mxu0 %v513_v1  ;;  %s1671_s23 = sshll.u32 %s449_s22, 1  ;;  %s2468_s25 = smov (!%p2079_p9, %s1759_s25), 15  ;;  %1899 = vmatpush3.msk.msra.mxu1 %vm942_vm3, %v1709_v56  ;;  %vm925_vm8 = vcmask 97280   ;;  %vm1175_vm9 = vcmask 1045504  }
  0x12   : > { %1816 = vmatpush3.msra.mxu0 %v513_v1  ;;  %s2077_s26 = sadd.s32 %s2074_s24, %s1671_s23  ;;  %s1681_s29 = sshll.u32 %s2466_s21, 1  ;;  %1898 = vmatprep.subr.mxu1 %v1708_v58 }
  0x13   : > { %s1673_s28 = sshll.u32 %s2077_s26, 3  ;;  %s466_s18 = sadd.s32 %s1681_s29, %s2074_s24  ;;  %1835 = vmatprep.subr.msk.mxu0 %vm942_vm3, %v1709_v56  ;;  %1900 = vmatpush3.msra.mxu1 %v1708_v58 }
  0x14   : > { %s454_s17 = scalar_lea.vmem %s2440_s0, %s1673_s28  ;;  %s1683_s19 = sshll.u32 %s466_s18, 3 }
  0x15   : > { %s468_s23 = scalar_lea.vmem %s2441_s1, %s1683_s19  ;;  %v2095_v4 = vld [vmem:[%s454_s17] sm:$0xff]  ;;  %s2470_s25 = smov (!%p2079_p9, %s2468_s25), 15  ;;  %v2103_v5 = vld [vmem:[%s454_s17 + $0x8] sm:$0xff]  ;;  %v2105_v6 = vld [vmem:[%s454_s17 + $0x10] sm:$0xff] }
  0x16   : > { %v501_v2 = vld [vmem:[%s468_s23] sm:$0xff]  ;;  %v502_v3 = vld [vmem:[%s468_s23 + $0x8] sm:$0xff]  ;;  %s1688_s21 = sshll.u32 %s2470_s25, 1  ;;  %v2111_v7 = vld [vmem:[%s454_s17 + $0x18] sm:$0xff]  ;;  %s1984_s20 = smov 8  }
  0x17   : > { %1817 = vmatprep.mubr.msk.f32.mxu0 %vm522_vm0, %v501_v2  ;;  %s483_s27 = sadd.s32 %s1688_s21, %s2074_s24  ;;  %v2114_v8 = vld [vmem:[%s454_s17 + $0x20] sm:$0xff]  ;;  %v2120_v9 = vld [vmem:[%s454_s17 + $0x28] sm:$0xff]  ;;  %v2122_v10 = vld [vmem:[%s454_s17 + $0x30] sm:$0xff]  ;;  %s2400_s10 = scalar_lea.vmem %s2449_s9, %s1673_s28 }
  0x18   : > { %1818 = vmatmul.mubr.msk.f32.vlgmr.msra.gmra.mxu0 %vm522_vm0, %v502_v3  ;;  %s1690_s29 = sshll.u32 %s483_s27, 3  ;;  %v2131_v11 = vld [vmem:[%s454_s17 + $0x38] sm:$0xff]  ;;  %s1983_s17 = smov 4  }
  0x19   : > { %1820 = vmatprep.mubr.msk.f32.mxu0 %vm522_vm0, %v2095_v4  ;;  %s485_s16 = scalar_lea.vmem %s2442_s2, %s1690_s29  ;;  %1836 = vmatpush3.msk.msra.mxu0 %vm942_vm3, %v1709_v56 }
  0x1a   : > { %v511_v12 = vld [vmem:[%s485_s16] sm:$0xff]  ;;  %v512_v13 = vld [vmem:[%s485_s16 + $0x8] sm:$0xff]  ;;  %s697_s24 = scalar_select %p696_p10, 1, 0  ;;  %1837 = vmatprep.subr.mxu0 %v1708_v58 }
  0x1b   : > { %1838 = vmatpush3.msra.mxu0 %v1708_v58  ;;  %s701_s29 = scalar_select %p700_p11, 1, 0 }
  0x1c   : > { %1821 = vmatmul.mubr.msk.f32.gmra.mxu0 %vm522_vm0, %v2103_v5  ;;  %v698_v15 = vstv %s697_s24 }
  0x1d   : > { %1823 = vmatprep.mubr.msk.f32.mxu0 %vm522_vm0, %v2105_v6  ;;  %vm699_vm1 = vcmp.eq.s32.totalorder %v698_v15, 1 }
  0x20   : > { %1824 = vmatmul.mubr.msk.f32.gmra.mxu0 %vm522_vm0, %v2111_v7 }
  0x21   : > { %1826 = vmatprep.mubr.msk.f32.mxu0 %vm522_vm0, %v2114_v8 }
  0x24   : > { %1827 = vmatmul.mubr.msk.f32.gmra.mxu0 %vm522_vm0, %v2120_v9 }
  0x25   : > { %1829 = vmatprep.mubr.msk.f32.mxu0 %vm522_vm0, %v2122_v10 }
  0x28   : > { %1830 = vmatmul.mubr.msk.f32.gmra.mxu0 %vm522_vm0, %v2131_v11 }
  0x29   : > { %1832 = vmatprep.mubr.msk.f32.mxu0 %vm522_vm0, %v511_v12 }
  0x2c   : > { %1833 = vmatmul.mubr.msk.f32.gmra.mxu0 %vm522_vm0, %v512_v13 }
  0xd8   : > { %v1819_v16 = vpop.f32.mrf.mxu0 }
  0xd9   : > { %v631_v17 = vadd.f32 %v1819_v16, %v2141_v14 }
  0xda   : > { %v625_v18 = vpop.f32.mrf.mxu0 }
  0xdb   : > { %v685_v19 = vmax.f32 %v631_v17, 0.0  ;;  %v626_v20 = vadd.f32 %v2141_v14, %v625_v18  ;;  %v702_v17 = vstv %s701_s29 }
  0xdc   : > { %v1822_v21 = vpop.f32.mrf.mxu0  ;;  %vm703_vm4 = vcmp.eq.s32.totalorder %v702_v17, 1 }
  0xdd   : > { %v709_v22 = vsel %vm699_vm1, %v685_v19, 0.0  ;;  %v684_v23 = vmax.f32 %v626_v20, 0.0  ;;  %v641_v24 = vadd.f32 %v1822_v21, %v2141_v14 }
  0xde   : > { %v734_v25 = vrot.slane %v709_v22, 7  ;;  %v635_v26 = vpop.f32.mrf.mxu0 }
  0xdf   : > { %v708_v27 = vsel %vm699_vm1, %v684_v23, 0.0  ;;  %v636_v28 = vadd.f32 %v2141_v14, %v635_v26  ;;  %v687_v30 = vmax.f32 %v641_v24, 0.0  ;;  %v2233_v23 = vld [vmem:[%s2445_s5 + $0x8] sm:$0xf] }
  0xe0   : > { %v733_v29 = vrot.slane %v708_v27, 7  ;;  %v1825_v31 = vpop.f32.mrf.mxu0  ;;  %v2148_v32 = vsel %vm732_vm2, %v734_v25, 0.0  ;;  %1851 = vmatprep.subr.msk.mxu1 %vm942_vm3, %v2233_v23 }
  0xe1   : > { %v686_v33 = vmax.f32 %v636_v28, 0.0  ;;  %v651_v34 = vadd.f32 %v1825_v31, %v2141_v14  ;;  %v2158_v41 = vrot.slane %v687_v30, 7  ;;  %v2247_v30 = vld [vmem:[%s2445_s5 + $0x28] sm:$0xf] }
  0xe2   : > { %v645_v35 = vpop.f32.mrf.mxu0  ;;  %v2152_v36 = vsel %vm732_vm2, 0.0, %v733_v29  ;;  %v2155_v37 = vsel %vm732_vm2, %v733_v29, %v734_v25  ;;  %1867 = vmatprep.subr.msk.mxu0 %vm942_vm3, %v2247_v30 }
  0xe3   : > { %v736_v38 = vrot.slane %v686_v33, 7  ;;  %v689_v39 = vmax.f32 %v651_v34, 0.0  ;;  %v646_v40 = vadd.f32 %v2141_v14, %v645_v35  ;;  %v774_v35 = vsel %vm732_vm2, %v2158_v41, 0.0 }
  0xe4   : > { %v1828_v42 = vpop.f32.mrf.mxu0 }
  0xe5   : > { %v740_v43 = vrot.slane %v689_v39, 7  ;;  %v688_v44 = vmax.f32 %v646_v40, 0.0  ;;  %v661_v45 = vadd.f32 %v1828_v42, %v2141_v14  ;;  %v2162_v46 = vsel %vm732_vm2, 0.0, %v736_v38 }
  0xe6   : > { %783 = vrot.lane.b32.xlu1 %v2162_v46, %s1983_s17  ;;  %v2168_v47 = vsel %vm732_vm2, %v736_v38, %v2158_v41  ;;  %v655_v48 = vpop.f32.mrf.mxu0 }
  0xe7   : > { %v739_v49 = vrot.slane %v688_v44, 7  ;;  %v691_v50 = vmax.f32 %v661_v45, 0.0  ;;  %785 = vrot.lane.b32.xlu0 %v2168_v47, %s1983_s17  ;;  %v656_v51 = vadd.f32 %v2141_v14, %v655_v48  ;;  %v2174_v52 = vsel %vm732_vm2, %v740_v43, 0.0 }
  0xe8   : > { %v1831_v59 = vpop.f32.mrf.mxu0 }
  0xe9   : > { %v743_v53 = vrot.slane %v691_v50, 7  ;;  %v690_v54 = vmax.f32 %v656_v51, 0.0  ;;  %v2177_v55 = vsel %vm732_vm2, %v739_v49, %v740_v43  ;;  %v2199_v61 = vsel %vm732_vm2, 0.0, %v739_v49 }
  0xea   : > { %810 = vrot.lane.b32.xlu1 %v2177_v55, %s1984_s20  ;;  %v671_v62 = vadd.f32 %v1831_v59, %v2141_v14  ;;  %v665_v0 = vpop.f32.mrf.mxu0 }
  0xeb   : > { %858 = vrot.lane.b32.xlu0 %v2174_v52, %s1983_s17  ;;  %v2187_v57 = vsel %vm732_vm2, %v743_v53, 0.0  ;;  %v742_v60 = vrot.slane %v690_v54, 7  ;;  %v666_v3 = vadd.f32 %v2141_v14, %v665_v0 }
  0xec   : > { %v693_v1 = vmax.f32 %v671_v62, 0.0  ;;  %v1834_v12 = vpop.f32.mrf.mxu0 }
  0xed   : > { %v2205_v63 = vsel %vm732_vm2, 0.0, %v742_v60  ;;  %v2213_v2 = vsel %vm732_vm2, %v742_v60, %v743_v53  ;;  %v681_v15 = vadd.f32 %v1834_v12, %v2141_v14  ;;  %v692_v16 = vmax.f32 %v666_v3, 0.0 }
  0xee   : > { %871 = vrot.lane.b32.xlu1 %v2187_v57, %s1984_s20  ;;  %v746_v13 = vrot.slane %v693_v1, 7  ;;  %v675_v19 = vpop.f32.mrf.mxu0 }
  0xef   : > { %787 = vrot.lane.b32.xlu0 %v2199_v61, %s1983_s17  ;;  %v695_v20 = vmax.f32 %v681_v15, 0.0  ;;  %v745_v21 = vrot.slane %v692_v16, 7  ;;  %v676_v22 = vadd.f32 %v2141_v14, %v675_v19  ;;  %v850_v19 = vld [vmem:[%s2445_s5] sm:$0xff] }
  0xf0   : > { %v777_v18 = vsel %vm732_vm2, %v746_v13, 0.0 }
  0xf1   : > { %v719_v24 = vsel %vm703_vm4, %v695_v20, 0.0  ;;  %v747_v25 = vsel %vm732_vm2, %v745_v21, %v746_v13  ;;  %v694_v26 = vmax.f32 %v676_v22, 0.0  ;;  %v771_v28 = vsel %vm732_vm2, 0.0, %v745_v21 }
  0xf2   : > { %812 = vrot.lane.b32.xlu1 %v2205_v63, %s1984_s20  ;;  %v749_v27 = vrot.slane %v719_v24, 7 }
  0xf3   : > { %789 = vrot.lane.b32.xlu0 %v2177_v55, %s1983_s17  ;;  %v718_v14 = vsel %vm703_vm4, %v694_v26, 0.0 }
  0xf4   : > { %v778_v29 = vsel %vm732_vm2, %v749_v27, 0.0  ;;  %v748_v31 = vrot.slane %v718_v14, 7 }
  0xf6   : > { %814 = vrot.lane.b32.xlu1 %v2213_v2, %s1984_s20  ;;  %v750_v33 = vsel %vm732_vm2, %v748_v31, %v749_v27  ;;  %v772_v34 = vsel %vm732_vm2, 0.0, %v748_v31 }
  0xf7   : > { %808 = vrot.lane.b32.xlu0 %v2199_v61, %s1984_s20 }
  0xfa   : > { %793 = vrot.lane.b32.xlu1 %v2213_v2, %s1983_s17 }
  0xfb   : > { %860 = vrot.lane.b32.xlu0 %v2187_v57, %s1983_s17 }
  0xfe   : > { %873 = vrot.lane.b32.xlu1 %v777_v18, %s1984_s20 }
  0xff   : > { %791 = vrot.lane.b32.xlu0 %v2205_v63, %s1983_s17 }
 0x102   : > { %818 = vrot.lane.b32.xlu1 %v747_v25, %s1984_s20 }
 0x103   : > { %862 = vrot.lane.b32.xlu0 %v777_v18, %s1983_s17 }
 0x106   : > { %797 = vrot.lane.b32.xlu1 %v747_v25, %s1983_s17 }
 0x107   : > { %816 = vrot.lane.b32.xlu0 %v771_v28, %s1984_s20 }
 0x10a   : > { %875 = vrot.lane.b32.xlu1 %v778_v29, %s1984_s20 }
 0x10b   : > { %795 = vrot.lane.b32.xlu0 %v771_v28, %s1983_s17 }
 0x10e   : > { %822 = vrot.lane.b32.xlu1 %v750_v33, %s1984_s20 }
 0x10f   : > { %820 = vrot.lane.b32.xlu0 %v772_v34, %s1984_s20 }
 0x112   : > { %869 = vrot.lane.b32.xlu1 %v2174_v52, %s1984_s20 }
 0x113   : > { %856 = vrot.lane.b32.xlu0 %v774_v35, %s1983_s17 }
 0x158   : > { %v784_v38 = vpop.permute.xlu1 %783 }
 0x159   : > { %v786_v39 = vpop.permute.xlu0 %785 }
 0x15a   : > { %v834_v41 = vsel %vm832_vm5, %v2155_v37, %v786_v39 }
 0x15c   : > { %v811_v40 = vpop.permute.xlu1 %810 }
 0x15d   : > { %v859_v42 = vpop.permute.xlu0 %858  ;;  %v2274_v54 = vsel %vm841_vm6, %v834_v41, %v811_v40 }
 0x15e   : > { %v882_v49 = vsel %vm832_vm5, %v774_v35, %v859_v42  ;;  %v1177_v3 = vrot.slane %v2274_v54, 2 }
 0x160   : > { %v872_v43 = vpop.permute.xlu1 %871 }
 0x161   : > { %v788_v44 = vpop.permute.xlu0 %787  ;;  %v2268_v51 = vsel %vm841_vm6, %v882_v49, %v872_v43 }
 0x162   : > { %v835_v50 = vsel %vm832_vm5, %v2162_v46, %v788_v44  ;;  %v833_v46 = vsel %vm832_vm5, %v2152_v36, %v784_v38  ;;  %v910_v60 = vrot.slane %v2268_v51, 1 }
 0x164   : > { %v813_v45 = vpop.permute.xlu1 %812 }
 0x165   : > { %v790_v48 = vpop.permute.xlu0 %789  ;;  %v2271_v53 = vsel %vm841_vm6, %v835_v50, %v813_v45 }
 0x166   : > { %v836_v56 = vsel %vm832_vm5, %v2168_v47, %v790_v48  ;;  %v907_v62 = vrot.slane %v2271_v53, 1  ;;  %v903_v47 = vrot.slane %v2274_v54, 1 }
 0x168   : > { %v815_v58 = vpop.permute.xlu1 %814 }
 0x169   : > { %v2281_v59 = vsel %vm841_vm6, %v836_v56, %v815_v58  ;;  %v809_v37 = vpop.permute.xlu0 %808 }
 0x16a   : > { %v908_v0 = vrot.slane %v2281_v59, 1  ;;  %v842_v1 = vsel %vm841_vm6, %v833_v46, %v809_v37 }
 0x16b   : > { %v902_v12 = vrot.slane %v842_v1, 1  ;;  %v1176_v36 = vrot.slane %v842_v1, 2 }
 0x16c   : > { %v794_v13 = vpop.permute.xlu1 %793  ;;  %v909_v15 = vsel %vm901_vm7, %v907_v62, %v908_v0  ;;  %v911_v16 = vsel %vm901_vm7, %v908_v0, %v910_v60 }
 0x16d   : > { %v861_v17 = vpop.permute.xlu0 %860  ;;  %v904_v18 = vsel %vm901_vm7, %v902_v12, %v903_v47  ;;  %1842 = vmatprep.mubr.msk.f32.mxu1 %vm925_vm8, %v909_v15  ;;  %v1178_v20 = vsel %vm1175_vm9, %v1176_v36, %v1177_v3  ;;  %v838_v26 = vsel %vm832_vm5, %v2177_v55, %v794_v13  ;;  %v1728_v36 = vld [vmem:[%s2445_s5 + $0x20] sm:$0xff] }
 0x16e   : > { %1839 = vmatprep.mubr.msk.f32.mxu0 %vm925_vm8, %v904_v18  ;;  %1843 = vmatmul.mubr.msk.f32.vlgmr.msra.gmra.mxu1 %vm925_vm8, %v911_v16  ;;  %v883_v14 = vsel %vm832_vm5, %v2174_v52, %v861_v17 }
 0x16f   : > { %1852 = vmatpush3.msk.msra.mxu1 %vm942_vm3, %v2233_v23 }
 0x170   : > { %v874_v21 = vpop.permute.xlu1 %873  ;;  %1853 = vmatprep.subr.mxu1 %v850_v19 }
 0x171   : > { %v792_v22 = vpop.permute.xlu0 %791  ;;  %1854 = vmatpush3.msra.mxu1 %v850_v19  ;;  %v2309_v29 = vsel %vm841_vm6, %v883_v14, %v874_v21  ;;  %v1354_v21 = vld [vmem:[%s2447_s7] sm:$0xf] }
 0x172   : > { %v837_v23 = vsel %vm832_vm5, %v2199_v61, %v792_v22  ;;  %v915_v55 = vrot.slane %v2309_v29, 1  ;;  %v1189_v17 = vrot.slane %v2309_v29, 2  ;;  %1883 = vmatprep.subr.msk.mxu1 %vm942_vm3, %v1354_v21 }
 0x174   : > { %v819_v24 = vpop.permute.xlu1 %818 }
 0x175   : > { %v863_v25 = vpop.permute.xlu0 %862  ;;  %v2304_v27 = vsel %vm841_vm6, %v838_v26, %v819_v24 }
 0x176   : > { %v913_v33 = vrot.slane %v2304_v27, 1  ;;  %v884_v52 = vsel %vm832_vm5, %v2187_v57, %v863_v25 }
 0x178   : > { %v798_v28 = vpop.permute.xlu1 %797  ;;  %v916_v42 = vsel %vm901_vm7, %v913_v33, %v915_v55 }
 0x179   : > { %v817_v31 = vpop.permute.xlu0 %816  ;;  %v840_v43 = vsel %vm832_vm5, %v2213_v2, %v798_v28 }
 0x17a   : > { %v846_v34 = vsel %vm841_vm6, %v837_v23, %v817_v31 }
 0x17b   : > { %v912_v35 = vrot.slane %v846_v34, 1 }
 0x17c   : > { %v876_v38 = vpop.permute.xlu1 %875 }
 0x17d   : > { %v796_v39 = vpop.permute.xlu0 %795  ;;  %v914_v40 = vsel %vm901_vm7, %v912_v35, %v913_v33  ;;  %v888_v61 = vsel %vm841_vm6, %v884_v52, %v876_v38 }
 0x17e   : > { %1845 = vmatprep.mubr.msk.f32.mxu1 %vm925_vm8, %v914_v40  ;;  %v839_v45 = vsel %vm832_vm5, %v2205_v63, %v796_v39  ;;  %v920_v50 = vrot.slane %v888_v61, 1  ;;  %v1194_v19 = vrot.slane %v888_v61, 2  ;;  %v1739_v39 = vld [vmem:[%s2446_s6] ss:$0 sm:$0xff] }
 0x17f   : > { %1846 = vmatmul.mubr.msk.f32.gmra.mxu1 %vm925_vm8, %v916_v42 }
 0x180   : > { %v823_v44 = vpop.permute.xlu1 %822 }
 0x181   : > { %v849_v48 = vsel %vm841_vm6, %v840_v43, %v823_v44  ;;  %v821_v49 = vpop.permute.xlu0 %820 }
 0x182   : > { %v918_v57 = vrot.slane %v849_v48, 1  ;;  %v848_v41 = vsel %vm841_vm6, %v839_v45, %v821_v49  ;;  %v1192_v15 = vrot.slane %v849_v48, 2 }
 0x183   : > { %v917_v56 = vrot.slane %v848_v41, 1  ;;  %v1191_v16 = vrot.slane %v848_v41, 2 }
 0x184   : > { %v870_v58 = vpop.permute.xlu1 %869  ;;  %v921_v46 = vsel %vm901_vm7, %v918_v57, %v920_v50 }
 0x185   : > { %v857_v37 = vpop.permute.xlu0 %856  ;;  %v919_v60 = vsel %vm901_vm7, %v917_v56, %v918_v57  ;;  %v1193_v18 = vsel %vm1175_vm9, %v1191_v16, %v1192_v15 }
 0x186   : > { %v881_v2 = vsel %vm832_vm5, %v2148_v32, %v857_v37  ;;  %1848 = vmatprep.mubr.msk.f32.mxu1 %vm925_vm8, %v919_v60  ;;  %v1182_v32 = vrot.slane %v2281_v59, 2 }
 0x187   : > { %v885_v63 = vsel %vm841_vm6, %v881_v2, %v870_v58  ;;  %1849 = vmatmul.mubr.msk.f32.gmra.mxu1 %vm925_vm8, %v921_v46 }
 0x188   : > { %v905_v62 = vrot.slane %v885_v63, 1  ;;  %v1179_v0 = vrot.slane %v885_v63, 2  ;;  %1855 = vmatprep.mubr.msk.f32.mxu1 %vm925_vm8, %v842_v1  ;;  %v1181_v1 = vrot.slane %v2271_v53, 2 }
 0x18a   : > { %v906_v12 = vsel %vm901_vm7, %v903_v47, %v905_v62  ;;  %v1180_v13 = vsel %vm1175_vm9, %v1177_v3, %v1179_v0  ;;  %v1186_v47 = vrot.slane %v846_v34, 2  ;;  %v1184_v3 = vrot.slane %v2268_v51, 2 }
 0x18b   : > { %1840 = vmatmul.mubr.msk.f32.vlgmr.msra.gmra.mxu0 %vm925_vm8, %v906_v12  ;;  %1856 = vmatmul.mubr.msk.f32.vlgmr.msra.gmra.mxu1 %vm925_vm8, %v2274_v54  ;;  %v1183_v54 = vsel %vm1175_vm9, %v1181_v1, %v1182_v32 }
 0x18c   : > { %1868 = vmatpush3.msk.msra.mxu0 %vm942_vm3, %v2247_v30  ;;  %1858 = vmatprep.mubr.msk.f32.mxu1 %vm925_vm8, %v2271_v53  ;;  %v1187_v30 = vrot.slane %v2304_v27, 2  ;;  %v1185_v53 = vsel %vm1175_vm9, %v1182_v32, %v1184_v3 }
 0x18d   : > { %1869 = vmatprep.subr.mxu0 %v1728_v36  ;;  %1871 = vmatprep.mubr.msk.f32.mxu0 %vm925_vm8, %v1178_v20  ;;  %v1195_v20 = vsel %vm1175_vm9, %v1192_v15, %v1194_v19 }
 0x18e   : > { %1870 = vmatpush3.msra.mxu0 %v1728_v36  ;;  %v1190_v51 = vsel %vm1175_vm9, %v1187_v30, %v1189_v17  ;;  %1884 = vmatpush3.msk.msra.mxu1 %vm942_vm3, %v1354_v21 }
 0x18f   : > { %1859 = vmatmul.mubr.msk.f32.gmra.mxu1 %vm925_vm8, %v2281_v59  ;;  %1872 = vmatmul.mubr.msk.f32.vlgmr.msra.gmra.mxu0 %vm925_vm8, %v1180_v13  ;;  %v1188_v59 = vsel %vm1175_vm9, %v1186_v47, %v1187_v30 }
 0x190   : > { %1861 = vmatprep.mubr.msk.f32.mxu1 %vm925_vm8, %v846_v34  ;;  %1874 = vmatprep.mubr.msk.f32.mxu0 %vm925_vm8, %v1183_v54 }
 0x193   : > { %1862 = vmatmul.mubr.msk.f32.gmra.mxu1 %vm925_vm8, %v2304_v27  ;;  %1875 = vmatmul.mubr.msk.f32.gmra.mxu0 %vm925_vm8, %v1185_v53 }
 0x194   : > { %1864 = vmatprep.mubr.msk.f32.mxu1 %vm925_vm8, %v848_v41  ;;  %1877 = vmatprep.mubr.msk.f32.mxu0 %vm925_vm8, %v1188_v59 }
 0x197   : > { %1865 = vmatmul.mubr.msk.f32.gmra.mxu1 %vm925_vm8, %v849_v48  ;;  %1878 = vmatmul.mubr.msk.f32.gmra.mxu0 %vm925_vm8, %v1190_v51 }
 0x198   : > { %1880 = vmatprep.mubr.msk.f32.mxu0 %vm925_vm8, %v1193_v18 }
 0x19b   : > { %1881 = vmatmul.mubr.msk.f32.gmra.mxu0 %vm925_vm8, %v1195_v20 }
 0x22e   : > { %v1844_v22 = vpop.f32.mrf.mxu1 }
 0x230   : > { %v1022_v24 = vpop.f32.mrf.mxu1 }
 0x23f   : > { %v1847_v25 = vpop.f32.mrf.mxu1 }
 0x241   : > { %v1032_v26 = vpop.f32.mrf.mxu1 }
 0x247   : > { %v1850_v27 = vpop.f32.mrf.mxu1 }
 0x249   : > { %v1042_v14 = vpop.f32.mrf.mxu1 }
 0x24b   : > { %v1841_v28 = vpop.f32.mrf.mxu0  ;;  %v1857_v29 = vpop.f32.mrf.mxu1 }
 0x24c   : > { %v1142_v33 = vadd.f32 %v1857_v29, %v1841_v28 }
 0x24d   : > { %v1012_v23 = vpop.f32.mrf.mxu0  ;;  %v1136_v31 = vpop.f32.mrf.mxu1 }
 0x24e   : > { %v1137_v55 = vadd.f32 %v1136_v31, %v1012_v23 }
 0x24f   : > { %v1860_v34 = vpop.f32.mrf.mxu1  ;;  %v1873_v35 = vpop.f32.mrf.mxu0 }
 0x250   : > { %v1324_v38 = vadd.f32 %v1873_v35, %v1142_v33  ;;  %v1152_v42 = vadd.f32 %v1860_v34, %v1844_v22 }
 0x251   : > { %v1146_v40 = vpop.f32.mrf.mxu1  ;;  %v1284_v52 = vpop.f32.mrf.mxu0 }
 0x252   : > { %v1323_v61 = vadd.f32 %v1284_v52, %v1137_v55  ;;  %v1339_v43 = vadd.f32 %v1739_v39, %v1324_v38  ;;  %v1147_v48 = vadd.f32 %v1146_v40, %v1022_v24  ;;  %v1740_v24 = vld [vmem:[%s2448_s8] ss:$0 sm:$0xff] }
 0x253   : > { %v1863_v44 = vpop.f32.mrf.mxu1  ;;  %v1876_v45 = vpop.f32.mrf.mxu0 }
 0x254   : > { %v1338_v49 = vadd.f32 %v1739_v39, %v1323_v61  ;;  %v1326_v50 = vadd.f32 %v1876_v45, %v1152_v42  ;;  %v1162_v58 = vadd.f32 %v1863_v44, %v1847_v25  ;;  %v1347_v37 = vmax.f32 %v1339_v43, 0.0 }
 0x255   : > { %v1156_v57 = vpop.f32.mrf.mxu1  ;;  %v1294_v41 = vpop.f32.mrf.mxu0 }
 0x256   : > { %v1346_v56 = vmax.f32 %v1338_v49, 0.0  ;;  %v1325_v46 = vadd.f32 %v1294_v41, %v1147_v48  ;;  %v1341_v60 = vadd.f32 %v1739_v39, %v1326_v50  ;;  %v1157_v62 = vadd.f32 %v1156_v57, %v1032_v26 }
 0x257   : > { %v1866_v2 = vpop.f32.mrf.mxu1  ;;  %v1879_v63 = vpop.f32.mrf.mxu0 }
 0x258   : > { %v1340_v0 = vadd.f32 %v1739_v39, %v1325_v46  ;;  %v1328_v12 = vadd.f32 %v1879_v63, %v1162_v58  ;;  %1885 = vmatprep.mubr.msk.f32.mxu1 %vm832_vm5, %v1346_v56  ;;  %v1172_v1 = vadd.f32 %v1866_v2, %v1850_v27  ;;  %v1349_v54 = vmax.f32 %v1341_v60, 0.0 }
 0x259   : > { %v1166_v36 = vpop.f32.mrf.mxu1  ;;  %v1304_v13 = vpop.f32.mrf.mxu0  ;;  %1886 = vmatmul.mubr.msk.f32.vlgmr.msra.gmra.mxu1 %vm832_vm5, %v1347_v37 }
 0x25a   : > { %v1348_v32 = vmax.f32 %v1340_v0, 0.0  ;;  %v1327_v47 = vadd.f32 %v1304_v13, %v1157_v62  ;;  %v1343_v3 = vadd.f32 %v1739_v39, %v1328_v12  ;;  %v1167_v53 = vadd.f32 %v1166_v36, %v1042_v14 }
 0x25b   : > { %v1882_v30 = vpop.f32.mrf.mxu0 }
 0x25c   : > { %v1342_v15 = vadd.f32 %v1739_v39, %v1327_v47  ;;  %v1330_v16 = vadd.f32 %v1882_v30, %v1172_v1  ;;  %1888 = vmatprep.mubr.msk.f32.mxu1 %vm832_vm5, %v1348_v32  ;;  %v1351_v18 = vmax.f32 %v1343_v3, 0.0 }
 0x25d   : > { %v1314_v59 = vpop.f32.mrf.mxu0  ;;  %1889 = vmatmul.mubr.msk.f32.gmra.mxu1 %vm832_vm5, %v1349_v54 }
 0x25e   : > { %v1350_v17 = vmax.f32 %v1342_v15, 0.0  ;;  %v1329_v51 = vadd.f32 %v1314_v59, %v1167_v53  ;;  %v1345_v19 = vadd.f32 %v1739_v39, %v1330_v16 }
 0x260   : > { %v1344_v20 = vadd.f32 %v1739_v39, %v1329_v51  ;;  %1891 = vmatprep.mubr.msk.f32.mxu1 %vm832_vm5, %v1350_v17  ;;  %v1353_v22 = vmax.f32 %v1345_v19, 0.0 }
 0x261   : > { %1892 = vmatmul.mubr.msk.f32.gmra.mxu1 %vm832_vm5, %v1351_v18 }
 0x262   : > { %v1352_v21 = vmax.f32 %v1344_v20, 0.0 }
 0x264   : > { %1894 = vmatprep.mubr.msk.f32.mxu1 %vm832_vm5, %v1352_v21 }
 0x265   : > { %1895 = vmatmul.mubr.msk.f32.gmra.mxu1 %vm832_vm5, %v1353_v22 }
 0x319   : > { %v1887_v25 = vpop.f32.mrf.mxu1 }
 0x31a   : > { %v1461_v26 = vadd.f32 %v1887_v25, %v1740_v24 }
 0x31b   : > { %v1455_v27 = vpop.f32.mrf.mxu1 }
 0x31c   : > { %v1495_v14 = vadd.f32 %v1461_v26, %v2103_v5  ;;  %v1456_v28 = vadd.f32 %v1740_v24, %v1455_v27 }
 0x31d   : > { %v1890_v29 = vpop.f32.mrf.mxu1 }
 0x31e   : > { %v1503_v23 = vmax.f32 %v1495_v14, 0.0  ;;  %v1494_v31 = vadd.f32 %v1456_v28, %v2095_v4  ;;  %v1471_v33 = vadd.f32 %v1890_v29, %v1740_v24 }
 0x31f   : > { %v1465_v34 = vpop.f32.mrf.mxu1 }
 0x320   : > { %1511 = vst.msk [vmem:[%s2400_s10 + $0x8] sm:$0xff] %vm522_vm0, %v1503_v23  ;;  %v1502_v5 = vmax.f32 %v1494_v31, 0.0  ;;  %v1497_v35 = vadd.f32 %v1471_v33, %v2111_v7  ;;  %v1466_v55 = vadd.f32 %v1740_v24, %v1465_v34 }
 0x321   : > { %v1893_v38 = vpop.f32.mrf.mxu1 }
 0x322   : > { %1510 = vst.msk [vmem:[%s2400_s10] sm:$0xff] %vm522_vm0, %v1502_v5  ;;  %v1505_v39 = vmax.f32 %v1497_v35, 0.0  ;;  %v1496_v40 = vadd.f32 %v1466_v55, %v2105_v6  ;;  %v1481_v52 = vadd.f32 %v1893_v38, %v1740_v24 }
 0x323   : > { %v1475_v42 = vpop.f32.mrf.mxu1 }
 0x324   : > { %1513 = vst.msk [vmem:[%s2400_s10 + $0x18] sm:$0xff] %vm522_vm0, %v1505_v39  ;;  %v1504_v4 = vmax.f32 %v1496_v40, 0.0  ;;  %v1499_v61 = vadd.f32 %v1481_v52, %v2120_v9  ;;  %v1476_v43 = vadd.f32 %v1740_v24, %v1475_v42 }
 0x325   : > { %v1896_v7 = vpop.f32.mrf.mxu1 }
 0x326   : > { %1512 = vst.msk [vmem:[%s2400_s10 + $0x10] sm:$0xff] %vm522_vm0, %v1504_v4  ;;  %v1507_v44 = vmax.f32 %v1499_v61, 0.0  ;;  %v1498_v45 = vadd.f32 %v1476_v43, %v2114_v8  ;;  %v1491_v48 = vadd.f32 %v1896_v7, %v1740_v24 }
 0x327   : > { %v1485_v49 = vpop.f32.mrf.mxu1 }
 0x328   : > { %1515 = vst.msk [vmem:[%s2400_s10 + $0x28] sm:$0xff] %vm522_vm0, %v1507_v44  ;;  %v1506_v6 = vmax.f32 %v1498_v45, 0.0  ;;  %v1501_v50 = vadd.f32 %v1491_v48, %v2131_v11  ;;  %v1486_v57 = vadd.f32 %v1740_v24, %v1485_v49 }
 0x32a   : > { %1514 = vst.msk [vmem:[%s2400_s10 + $0x20] sm:$0xff] %vm522_vm0, %v1506_v6  ;;  %v1509_v41 = vmax.f32 %v1501_v50, 0.0  ;;  %v1500_v9 = vadd.f32 %v1486_v57, %v2122_v10 }
 0x32c   : > { %1517 = vst.msk [vmem:[%s2400_s10 + $0x38] sm:$0xff] %vm522_vm0, %v1509_v41  ;;  %v1508_v56 = vmax.f32 %v1500_v9, 0.0 }
 0x32e   : > { %1516 = vst.msk [vmem:[%s2400_s10 + $0x30] sm:$0xff] %vm522_vm0, %v1508_v56 }
 0x32f PF: > { %s19_s13 = sadd.s32 1, %s1981_s13   ;;  %s2451_s30 = smov %s1973_s11 }
 0x330   : > { %p16_p12 = scmp.ge.s32.totalorder %s19_s13, 10   ;;  %s2452_s10 = smov %s1977_s12 }
 0x331   : > { %s2453_s11 = smov %s2456_s14  ;;  %s2454_s12 = smov %s2460_s15 }
 0x332   :  { %18 = sbr.rel (!%p16_p12) target bundleno = 3 (0x3), region = 94 }

</bundles_post_ra>
